<compile_context>
chip_gen: v5e
topology: v5e:2x2
jax: 0.10.0
libtpu: 0.0.40
codegen_flags: <defaults>
</compile_context>

<pallas_src>
import functools

import jax
import jax.numpy as jnp
from jax.experimental import pallas as pl
from jax.experimental.pallas import tpu as pltpu


def _label_softmax_loss_kernel(logits_ref, labels_ref, anchor_ref, acc_ref, *,
                               n_rows):
    i = pl.program_id(0)

    @pl.when(i == 0)
    def _init():
        acc_ref[0] = jnp.float32(0.0)
        acc_ref[1] = jnp.float32(0.0)

    logits = logits_ref[...].astype(jnp.float32)     # (TN, C), f32 for LSE path
    labels = labels_ref[...]                         # (TN, C), input dtype
    anchor = anchor_ref[...]                         # (TN, 1), input dtype

    tn, c = logits.shape

    # Valid-row mask: guards the padded tail of the last (partial) batch tile.
    row = jax.lax.broadcasted_iota(jnp.int32, (tn, 1), 0)
    valid = (i * tn + row) < n_rows                  # (TN, 1) bool
    mask = jnp.logical_and(anchor == 1.0, valid)     # anchor_state == 1 rows

    # Numerically-stable log-sum-exp over classes.
    row_max = jnp.max(logits, axis=-1, keepdims=True)            # (TN, 1)
    lse = jnp.log(jnp.sum(jnp.exp(logits - row_max),
                          axis=-1, keepdims=True)) + row_max     # (TN, 1)

    # argmax(labels, axis=1) with first-occurrence tie-break, in input dtype.
    lane = jax.lax.broadcasted_iota(jnp.int32, (tn, c), 1)       # (TN, C)
    lbl_max = jnp.max(labels, axis=-1, keepdims=True)            # (TN, 1)
    idx = jnp.min(jnp.where(labels == lbl_max, lane, c),
                  axis=-1, keepdims=True)                        # (TN, 1)

    # Gather logits at the argmax class via one-hot select + lane reduce.
    sel = jnp.sum(jnp.where(lane == idx, logits, 0.0),
                  axis=-1, keepdims=True)                        # (TN, 1)
    per_row_ce = lse - sel                                       # (TN, 1)

    # Accumulate masked sum / count into the SMEM output (carried over grid).
    acc_ref[0] += jnp.sum(jnp.where(mask, per_row_ce, 0.0))
    acc_ref[1] += jnp.sum(mask.astype(jnp.float32))


def label_softmax_loss(y_pred, y_true, *, tn=None):
    """y_pred: (N, C) float logits; y_true: (N, C+1), last column = anchor state."""
    n, c = y_pred.shape
    assert y_true.shape == (n, c + 1)

    # Split outside the kernel so both kernel inputs are lane-dense.
    labels = y_true[:, :c]          # (N, C)
    anchor = y_true[:, c:c + 1]     # (N, 1)

    pred_isz = jnp.dtype(y_pred.dtype).itemsize
    true_isz = jnp.dtype(y_true.dtype).itemsize
    per_row_bytes = c * pred_isz + c * true_isz + true_isz

    if tn is None:
        # Double-buffered input tiles under ~12 MiB -> <=24 MiB VMEM,
        # comfortable on v7x (64 MiB physical) and v5e/v6e (128 MiB).
        budget = 12 * 1024 * 1024
        tn = max(8, budget // (2 * max(per_row_bytes, 1)))
    if tn >= n:
        tn = n                              # single block (block dim == array dim)
    else:
        tn = max(8, (tn // 8) * 8)          # sublane-aligned batch tile

    grid = (pl.cdiv(n, tn),)
    vmem_limit = int(min(max(4 * tn * per_row_bytes + (1 << 20), 8 << 20),
                         32 << 20))

    sums = pl.pallas_call(
        functools.partial(_label_softmax_loss_kernel, n_rows=n),
        out_shape=jax.ShapeDtypeStruct((2,), jnp.float32),
        grid_spec=pltpu.PrefetchScalarGridSpec(
            num_scalar_prefetch=0,
            grid=grid,
            in_specs=[
                pl.BlockSpec((tn, c), lambda i: (i, 0)),   # logits
                pl.BlockSpec((tn, c), lambda i: (i, 0)),   # labels
                pl.BlockSpec((tn, 1), lambda i: (i, 0)),   # anchor state
            ],
            out_specs=pl.BlockSpec(memory_space=pltpu.MemorySpace.SMEM),
        ),
        compiler_params=pltpu.CompilerParams(
            dimension_semantics=("arbitrary",),
            vmem_limit_bytes=vmem_limit,
        ),
    )(y_pred, labels, anchor)

    # Finish the masked mean (CrossEntropyLoss reduction='mean') in plain JAX.
    return sums[0] / sums[1]


def _reference(y_pred, y_true):
    labels = y_true[:, :-1]
    anchor = y_true[:, -1]
    mask = (anchor == 1.0)
    tgt = jnp.argmax(labels, axis=1)
    logp = jax.nn.log_softmax(y_pred.astype(jnp.float32), axis=-1)
    ce = -jnp.take_along_axis(logp, tgt[:, None], axis=1)[:, 0]
    return jnp.sum(jnp.where(mask, ce, 0.0)) / jnp.sum(mask.astype(jnp.float32))


if __name__ == "__main__":
    key = jax.random.PRNGKey(0)
    k_pred, k_cls, k_state = jax.random.split(key, 3)

    # Small test shape; N=56 with tn=16 gives a 4-step grid whose last tile is
    # partial, exercising both the SMEM accumulation and the tail row mask.
    N, C = 56, 16
    y_pred = jax.random.normal(k_pred, (N, C), dtype=jnp.float32)

    # One-hot labels plus an anchor-state column in {0, 1}.
    cls = jax.random.randint(k_cls, (N,), 0, C)
    onehot = jax.nn.one_hot(cls, C, dtype=jnp.float32)
    anchor = jax.random.randint(k_state, (N,), 0, 2).astype(jnp.float32)
    anchor = anchor.at[0].set(1.0)                     # guarantee >=1 selected row
    y_true = jnp.concatenate([onehot, anchor[:, None]], axis=1)   # (N, C+1)

    loss = label_softmax_loss(y_pred, y_true, tn=16)
    jax.block_until_ready(loss)

    ref = _reference(y_pred, y_true)
    assert jnp.allclose(loss, ref, atol=1e-5, rtol=1e-5), (loss, ref)

    print("KERNEL_OK")
</pallas_src>

<mosaic_0001>
module attributes {stable_mosaic.version = 11 : i64} {
  func.func @_label_softmax_loss_kernel(%arg0: i32, %arg1: memref<16x16xf32, #tpu.memory_space<vmem>>, %arg2: memref<16x16xf32, #tpu.memory_space<vmem>>, %arg3: memref<16x1xf32, #tpu.memory_space<vmem>>, %arg4: memref<2xf32, #tpu.memory_space<smem>>) attributes {dimension_semantics = [#tpu.dimension_semantics<arbitrary>], iteration_bounds = array<i64: 4>, scalar_prefetch = 0 : i64, scratch_operands = 0 : i64, tpu.core_type = #tpu.core_type<tc>, window_params = [{transform_indices = @transform_0, window_bounds = array<i64: 16, 16>}, {transform_indices = @transform_1, window_bounds = array<i64: 16, 16>}, {transform_indices = @transform_2, window_bounds = array<i64: 16, 1>}, {transform_indices = @transform_3, window_bounds = array<i64: 2>}]} {
    %c0_i32 = arith.constant 0 : i32
    %0 = arith.cmpi eq, %arg0, %c0_i32 : i32
    %1 = arith.extui %0 : i1 to i32
    %c0_i32_0 = arith.constant 0 : i32
    %2 = arith.cmpi ne, %1, %c0_i32_0 : i32
    scf.if %2 {
      %cst_19 = arith.constant 0.000000e+00 : f32
      %c0_20 = arith.constant 0 : index
      %58 = memref.load %arg4[%c0_20] : memref<2xf32, #tpu.memory_space<smem>>
      memref.store %cst_19, %arg4[%c0_20] : memref<2xf32, #tpu.memory_space<smem>>
      %cst_21 = arith.constant 0.000000e+00 : f32
      %c1_22 = arith.constant 1 : index
      %59 = memref.load %arg4[%c1_22] : memref<2xf32, #tpu.memory_space<smem>>
      memref.store %cst_21, %arg4[%c1_22] : memref<2xf32, #tpu.memory_space<smem>>
    } else {
    }
    %c0 = arith.constant 0 : index
    %c0_1 = arith.constant 0 : index
    %3 = vector.load %arg1[%c0, %c0_1] : memref<16x16xf32, #tpu.memory_space<vmem>>, vector<16x16xf32>
    %c0_2 = arith.constant 0 : index
    %c0_3 = arith.constant 0 : index
    %4 = vector.load %arg2[%c0_2, %c0_3] : memref<16x16xf32, #tpu.memory_space<vmem>>, vector<16x16xf32>
    %c0_4 = arith.constant 0 : index
    %c0_5 = arith.constant 0 : index
    %5 = vector.load %arg3[%c0_4, %c0_5] : memref<16x1xf32, #tpu.memory_space<vmem>>, vector<16x1xf32>
    %6 = tpu.iota {dimensions = array<i32: 0>} : vector<16x1xi32>
    %c16_i32 = arith.constant 16 : i32
    %7 = arith.muli %arg0, %c16_i32 : i32
    %8 = vector.broadcast %7 : i32 to vector<16x1xi32>
    %9 = arith.addi %8, %6 : vector<16x1xi32>
    %c56_i32 = arith.constant 56 : i32
    %10 = vector.broadcast %c56_i32 : i32 to vector<16x1xi32>
    %11 = arith.cmpi slt, %9, %10 : vector<16x1xi32>
    %cst = arith.constant 1.000000e+00 : f32
    %12 = vector.broadcast %cst : f32 to vector<16x1xf32>
    %13 = arith.cmpf oeq, %5, %12 : vector<16x1xf32>
    %14 = arith.andi %13, %11 : vector<16x1xi1>
    %cst_6 = arith.constant dense<0xFF800000> : vector<16xf32>
    %15 = vector.multi_reduction <maximumf>, %3, %cst_6 [1] : vector<16x16xf32> to vector<16xf32>
    %16 = vector.shape_cast %15 : vector<16xf32> to vector<16x1xf32>
    %17 = vector.broadcast %16 : vector<16x1xf32> to vector<16x16xf32>
    %18 = arith.subf %3, %17 : vector<16x16xf32>
    %19 = math.exp %18 : vector<16x16xf32>
    %cst_7 = arith.constant dense<0.000000e+00> : vector<16xf32>
    %20 = vector.multi_reduction <add>, %19, %cst_7 [1] : vector<16x16xf32> to vector<16xf32>
    %21 = vector.shape_cast %20 : vector<16xf32> to vector<16x1xf32>
    %22 = math.log %21 : vector<16x1xf32>
    %23 = arith.addf %22, %16 : vector<16x1xf32>
    %24 = tpu.iota {dimensions = array<i32: 1>} : vector<16x16xi32>
    %cst_8 = arith.constant dense<0xFF800000> : vector<16xf32>
    %25 = vector.multi_reduction <maximumf>, %4, %cst_8 [1] : vector<16x16xf32> to vector<16xf32>
    %26 = vector.shape_cast %25 : vector<16xf32> to vector<16x1xf32>
    %27 = vector.broadcast %26 : vector<16x1xf32> to vector<16x16xf32>
    %28 = arith.cmpf oeq, %4, %27 : vector<16x16xf32>
    %c16_i32_9 = arith.constant 16 : i32
    %29 = vector.broadcast %c16_i32_9 : i32 to vector<16x16xi32>
    %30 = arith.select %28, %24, %29 : vector<16x16xi1>, vector<16x16xi32>
    %cst_10 = arith.constant dense<2147483647> : vector<16xi32>
    %31 = vector.multi_reduction <minsi>, %30, %cst_10 [1] : vector<16x16xi32> to vector<16xi32>
    %32 = vector.shape_cast %31 : vector<16xi32> to vector<16x1xi32>
    %33 = vector.broadcast %32 : vector<16x1xi32> to vector<16x16xi32>
    %34 = arith.cmpi eq, %24, %33 : vector<16x16xi32>
    %cst_11 = arith.constant 0.000000e+00 : f32
    %35 = vector.broadcast %cst_11 : f32 to vector<16x16xf32>
    %36 = arith.select %34, %3, %35 : vector<16x16xi1>, vector<16x16xf32>
    %cst_12 = arith.constant dense<0.000000e+00> : vector<16xf32>
    %37 = vector.multi_reduction <add>, %36, %cst_12 [1] : vector<16x16xf32> to vector<16xf32>
    %38 = vector.shape_cast %37 : vector<16xf32> to vector<16x1xf32>
    %39 = arith.subf %23, %38 : vector<16x1xf32>
    %c0_13 = arith.constant 0 : index
    %40 = memref.load %arg4[%c0_13] : memref<2xf32, #tpu.memory_space<smem>>
    %cst_14 = arith.constant 0.000000e+00 : f32
    %41 = vector.broadcast %cst_14 : f32 to vector<16x1xf32>
    %42 = arith.select %14, %39, %41 : vector<16x1xi1>, vector<16x1xf32>
    %43 = vector.shape_cast %42 : vector<16x1xf32> to vector<1x16x1xf32>
    %cst_15 = arith.constant dense<0.000000e+00> : vector<1xf32>
    %44 = vector.multi_reduction <add>, %43, %cst_15 [1, 2] : vector<1x16x1xf32> to vector<1xf32>
    %45 = vector.shape_cast %44 : vector<1xf32> to vector<1x1x1xf32>
    %46 = vector.extract %45[0, 0, 0] : f32 from vector<1x1x1xf32>
    %47 = arith.addf %40, %46 : f32
    %c0_16 = arith.constant 0 : index
    %48 = memref.load %arg4[%c0_16] : memref<2xf32, #tpu.memory_space<smem>>
    memref.store %47, %arg4[%c0_16] : memref<2xf32, #tpu.memory_space<smem>>
    %c1 = arith.constant 1 : index
    %49 = memref.load %arg4[%c1] : memref<2xf32, #tpu.memory_space<smem>>
    %50 = arith.extui %14 : vector<16x1xi1> to vector<16x1xi32>
    %51 = arith.sitofp %50 : vector<16x1xi32> to vector<16x1xf32>
    %52 = vector.shape_cast %51 : vector<16x1xf32> to vector<1x16x1xf32>
    %cst_17 = arith.constant dense<0.000000e+00> : vector<1xf32>
    %53 = vector.multi_reduction <add>, %52, %cst_17 [1, 2] : vector<1x16x1xf32> to vector<1xf32>
    %54 = vector.shape_cast %53 : vector<1xf32> to vector<1x1x1xf32>
    %55 = vector.extract %54[0, 0, 0] : f32 from vector<1x1x1xf32>
    %56 = arith.addf %49, %55 : f32
    %c1_18 = arith.constant 1 : index
    %57 = memref.load %arg4[%c1_18] : memref<2xf32, #tpu.memory_space<smem>>
    memref.store %56, %arg4[%c1_18] : memref<2xf32, #tpu.memory_space<smem>>
    return
  }
  func.func @transform_0(%arg0: i32) -> (i32, i32) {
    %c0_i32 = arith.constant 0 : i32
    %c0_i32_0 = arith.constant 0 : i32
    return %arg0, %c0_i32 : i32, i32
  }
  func.func @transform_1(%arg0: i32) -> (i32, i32) {
    %c0_i32 = arith.constant 0 : i32
    %c0_i32_0 = arith.constant 0 : i32
    return %arg0, %c0_i32 : i32, i32
  }
  func.func @transform_2(%arg0: i32) -> (i32, i32) {
    %c0_i32 = arith.constant 0 : i32
    %c0_i32_0 = arith.constant 0 : i32
    return %arg0, %c0_i32 : i32, i32
  }
  func.func @transform_3(%arg0: i32) -> i32 {
    %c0_i32 = arith.constant 0 : i32
    %c0_i32_0 = arith.constant 0 : i32
    return %c0_i32 : i32
  }
}

</mosaic_0001>

<bundles_post_ra>
// kernel: tpu_custom_call.1
= control target key start
LH: loop header
LB: loop body
LE: loop exit
PB: predicated region body
PF: predicated region fallthrough
CT: control target
= control target key end

     0   :  { %8 = vsyncpa [#allocation3], 0  ;;  %s580_s12 = smov 0   ;;  %s652_s0 = inlined_call_operand.vmem [shape: f32[56,16], index: 0, kind: input, shape index: {}]   ;;  %s653_s1 = inlined_call_operand.vmem [shape: f32[56,16], index: 1, kind: input, shape index: {}]   ;;  %s654_s2 = inlined_call_operand.vmem [shape: f32[56,1], index: 2, kind: input, shape index: {}]   ;;  %s655_s3 = inlined_call_operand.hbm [shape: f32[2], index: 3, kind: output, shape index: {}]  }
   0x1 LB: > { %s586_s13 = sadd.s32 4294967295, %s555_s12   ;;  %p482_p0 = scmp.ge.s32.totalorder %s555_s12, 1  ;;  %s555_s12 = sphi %s580_s12, %s14_s12  }
   0x2   : > { %p180_p1 = scmp.lt.s32.totalorder %s555_s12, 5 }
   0x4   : > { %p181_p2 = pnand %p482_p0, %p180_p1 }
   0x5   : > { %s483_s14 = sshll.u32 (!%p181_p2), %s586_s13, 1  ;;  %s490_s22 = sshll.u32 (!%p181_p2), %s586_s13, 4 }
   0x6   : > { %184 = sbr.rel (%p181_p2) target bundleno = 696 (0x2b8), region = 32  ;;  %p226_p3 = scmp.lt.s32.totalorder (!%p181_p2), %s483_s14, 6 }
   0x7   : > { %p509_p4 = scmp.eq.s32.totalorder (!%p181_p2), %s586_s13, 0  ;;  %s558_s26 = smov (!%p181_p2), 0.0  }
   0x8   : > { %s414_s4 = sshll.u32 (!%p181_p2), %s655_s3, 4  ;;  %p510_p5 = scmp.eq.s32.totalorder (!%p181_p2), %s586_s13, 3  ;;  %s415_s4 = int_to_ptr.hbm [resolvable:$true] %s414_s4 }
   0x9   : > { %s559_s9 = smov (!%p181_p2), [#allocation2]  }
   0xb   : > { %s661_s14 = smov (!%p226_p3, %s483_s14), 6  ;;  %vm290_vm0 = vcmask 130048   ;;  %v277_v8 = vlaneseq  ;;  %v281_v53 = vstv %s490_s22  ;;  %vm372_vm13 = vcmask 7168   ;;  %503 = sst [smem:[#allocation2]] (%p509_p4), %s558_s26 }
   0xc   : > { %s591_s15 = sshll.u32 %s661_s14, 3  ;;  %v557_v61 = vmov 0.0   ;;  %504 = sst [smem:[#allocation2 + $0x1]] (%p509_p4), %s558_s26 }
   0xd   : > { %s243_s18 = scalar_lea.vmem %s653_s1, %s591_s15  ;;  %s229_s21 = scalar_lea.vmem %s652_s0, %s591_s15  ;;  %v316_v9 = vand.u32 127, %v277_v8  ;;  %v278_v52 = vshrl.u32 %v277_v8, 7 }
   0xe   : > { %v273_v0 = vld [vmem:[%s243_s18] sm:$0xff]  ;;  %v274_v4 = vld [vmem:[%s243_s18 + $0x8] sm:$0xff]  ;;  %s257_s25 = scalar_lea.vmem %s654_s2, %s591_s15  ;;  %s369_s27 = sld [smem:[#allocation2]] }
   0xf   : > { %v271_v1 = vld [vmem:[%s229_s21] sm:$0xff]  ;;  %v317_v2 = vsel %vm290_vm0, %v273_v0, -inf  ;;  %v320_v5 = vsel %vm290_vm0, %v274_v4, -inf  ;;  %v272_v6 = vld [vmem:[%s229_s21 + $0x8] sm:$0xff]  ;;  %v282_v54 = vadd.s32 %v281_v53, %v278_v52  ;;  %v279_v56 = vadd.s32 8, %v278_v52  ;;  %s491_s28 = sld [smem:[#allocation2 + $0x1]] }
  0x10   : > { %v291_v3 = vsel %vm290_vm0, %v271_v1, -inf  ;;  %318 = vmax.xlane.f32.xlu0 %v317_v2  ;;  %v294_v7 = vsel %vm290_vm0, %v272_v6, -inf  ;;  %v275_v55 = vld [vmem:[%s257_s25] sm:$0xff]  ;;  %v276_v58 = vld [vmem:[%s257_s25 + $0x8] sm:$0xff] }
  0x11   : > { %292 = vmax.xlane.f32.xlu2 %v291_v3  ;;  %vm284_vm7 = vcmp.lt.s32.totalorder %v282_v54, 56  ;;  %vm286_vm8 = vcmp.eq.f32.partialorder %v275_v55, 1.0  ;;  %v283_v57 = vadd.s32 %v281_v53, %v279_v56  ;;  %vm287_vm11 = vcmp.eq.f32.partialorder %v276_v58, 1.0 }
  0x12   : > { %vm622_vm9 = vmand %vm286_vm8, %vm284_vm7 }
  0x13   : > { %vm285_vm10 = vcmp.lt.s32.totalorder %v283_v57, 56  ;;  %v492_v62 = vsel %vm622_vm9, 1.0, %v557_v61 }
  0x14   : > { %vm626_vm12 = vmand %vm287_vm11, %vm285_vm10 }
  0x15   : > { %v493_v63 = vsel %vm626_vm12, 1.0, %v557_v61 }
  0x18   : > { %321 = vmax.xlane.f32.xlu0 %v320_v5 }
  0x19   : > { %295 = vmax.xlane.f32.xlu2 %v294_v7 }
  0x83   : > { %v319_v10 = vpop.xlane.xlu0 %318 }
  0x84   : > { %v605_v11 = vpop.xlane.xlu2 %292  ;;  %vm323_vm1 = vcmp.eq.f32.partialorder %v273_v0, %v319_v10  ;;  %v393_v0 = vsel %vm372_vm13, %v492_v62, 0.0 }
  0x85   : > { %v297_v12 = vsub.f32 %v271_v1, %v605_v11  ;;  %v325_v13 = vsel %vm323_vm1, %v316_v9, 16 }
  0x86   : > { %v327_v14 = vsel %vm290_vm0, %v325_v13, 2147483647 }
  0x87   : > { %v299_v15 = vmul.f32 1.442695, %v297_v12  ;;  %v329_v16 = vshra.s32 %v327_v14, 16  ;;  %v328_v28 = vand.u32 65535, %v327_v14 }
  0x89   : > { %523 = vpow2.f32 %v299_v15  ;;  %v331_v17 = vcvt.s32.f32 %v329_v16  ;;  %v330_v30 = vcvt.s32.f32 %v328_v28 }
  0x8b   : > { %332 = vmin.xlane.f32.xlu1 %v331_v17  ;;  %v322_v18 = vpop.xlane.xlu0 %321 }
  0x8c   : > { %vm324_vm2 = vcmp.eq.f32.partialorder %v274_v4, %v322_v18  ;;  %v611_v25 = vpop.xlane.xlu2 %295 }
  0x8d   : > { %v326_v19 = vsel %vm324_vm2, %v316_v9, 16  ;;  %v298_v26 = vsub.f32 %v272_v6, %v611_v25 }
  0x8e   : > { %v342_v21 = vsel %vm290_vm0, %v326_v19, 2147483647 }
  0x8f   : > { %v524_v20 = vpop.eup %523  ;;  %v344_v22 = vshra.s32 %v342_v21, 16  ;;  %v301_v27 = vmul.f32 1.442695, %v298_v26  ;;  %v343_v32 = vand.u32 65535, %v342_v21 }
  0x90   : > { %v303_v23 = vsel %vm290_vm0, %v524_v20, 0.0 }
  0x91   : > { %304 = vadd.xlane.f32.xlu2 %v303_v23  ;;  %v346_v24 = vcvt.s32.f32 %v344_v22  ;;  %525 = vpow2.f32 %v301_v27  ;;  %v345_v35 = vcvt.s32.f32 %v343_v32 }
  0x93   : > { %347 = vmin.xlane.f32.xlu1 %v346_v24 }
  0x97   : > { %v526_v33 = vpop.eup %525 }
  0x98   : > { %v306_v36 = vsel %vm290_vm0, %v526_v33, 0.0 }
  0xfe   : > { %v333_v29 = vpop.xlane.xlu1 %332 }
  0xff   : > { %vm334_vm3 = vcmp.eq.f32.partialorder %v331_v17, %v333_v29  ;;  %v339_v38 = vcvt.f32.s32 %v333_v29 }
 0x100   : > { %v335_v31 = vsel %vm334_vm3, %v330_v30, inf }
 0x101   : > { %336 = vmin.xlane.f32.xlu0 %v335_v31  ;;  %v340_v40 = vshll.u32 %v339_v38, 16 }
 0x104   : > { %v305_v3 = vpop.xlane.xlu2 %304 }
 0x105   : > { %527 = vlog2.f32 %v305_v3 }
 0x106   : > { %v348_v34 = vpop.xlane.xlu1 %347 }
 0x107   : > { %vm349_vm4 = vcmp.eq.f32.partialorder %v346_v24, %v348_v34  ;;  %v354_v43 = vcvt.f32.s32 %v348_v34 }
 0x108   : > { %v350_v37 = vsel %vm349_vm4, %v345_v35, inf }
 0x109   : > { %351 = vmin.xlane.f32.xlu1 %v350_v37  ;;  %307 = vadd.xlane.f32.xlu0 %v306_v36  ;;  %v355_v47 = vshll.u32 %v354_v43, 16 }
 0x10b   : > { %v528_v5 = vpop.eup %527 }
 0x174   : > { %v337_v39 = vpop.xlane.xlu0 %336 }
 0x175   : > { %v338_v41 = vcvt.f32.s32 %v337_v39 }
 0x177   : > { %v341_v42 = vadd.s32 %v340_v40, %v338_v41 }
 0x179   : > { %vm357_vm5 = vcmp.eq.s32.totalorder %v316_v9, %v341_v42 }
 0x17a   : > { %v359_v44 = vsel %vm357_vm5, %v271_v1, 0.0  ;;  %v394_v1 = vsel %vm372_vm13, %v493_v63, 0.0 }
 0x17b   : > { %v361_v45 = vsel %vm290_vm0, %v359_v44, 0.0  ;;  %v395_v2 = vadd.f32 %v394_v1, %v393_v0 }
 0x17c   : > { %v352_v46 = vpop.xlane.xlu1 %351  ;;  %362 = vadd.xlane.f32.xlu1 %v361_v45  ;;  %v308_v4 = vpop.xlane.xlu0 %307 }
 0x17d   : > { %v353_v48 = vcvt.f32.s32 %v352_v46  ;;  %529 = vlog2.f32 %v308_v4 }
 0x17f   : > { %v356_v49 = vadd.s32 %v355_v47, %v353_v48 }
 0x181   : > { %vm358_vm6 = vcmp.eq.s32.totalorder %v316_v9, %v356_v49 }
 0x182   : > { %v360_v50 = vsel %vm358_vm6, %v272_v6, 0.0  ;;  %v310_v6 = vmul.f32 0.6931472, %v528_v5 }
 0x183   : > { %v364_v51 = vsel %vm290_vm0, %v360_v50, 0.0  ;;  %v530_v7 = vpop.eup %529 }
 0x184   : > { %365 = vadd.xlane.f32.xlu2 %v364_v51  ;;  %396 = vadd.xlane.f32.xlu1 %v395_v2  ;;  %v312_v9 = vmul.f32 0.6931472, %v530_v7  ;;  %v313_v10 = vadd.f32 %v310_v6, %v605_v11 }
 0x186   : > { %v314_v13 = vadd.f32 %v312_v9, %v611_v25 }
 0x1ef   : > { %v363_v8 = vpop.xlane.xlu1 %362 }
 0x1f0   : > { %v367_v12 = vsub.f32 %v313_v10, %v363_v8 }
 0x1f2   : > { %v370_v15 = vsel %vm622_vm9, %v367_v12, 0.0 }
 0x1f3   : > { %v373_v18 = vsel %vm372_vm13, %v370_v15, 0.0 }
 0x1f7   : > { %v366_v14 = vpop.xlane.xlu2 %365  ;;  %v397_v11 = vpop.xlane.xlu1 %396 }
 0x1f8   : > { %v368_v16 = vsub.f32 %v314_v13, %v366_v14  ;;  %v398_v21 = vrot.slane %v397_v11, 4 }
 0x1fa   : > { %v371_v17 = vsel %vm626_vm12, %v368_v16, 0.0  ;;  %v399_v22 = vadd.f32 %v398_v21, %v397_v11 }
 0x1fb   : > { %v374_v19 = vsel %vm372_vm13, %v371_v17, 0.0 }
 0x1fc   : > { %v375_v20 = vadd.f32 %v374_v19, %v373_v18  ;;  %v400_v23 = vrot.slane %v399_v22, 2 }
 0x1fe   : > { %376 = vadd.xlane.f32.xlu0 %v375_v20  ;;  %v401_v27 = vadd.f32 %v400_v23, %v399_v22 }
 0x200   : > { %v402_v30 = vrot.slane %v401_v27, 1 }
 0x202   : > { %v403_v33 = vadd.f32 %v402_v30, %v401_v27 }
 0x271   : > { %v377_v24 = vpop.xlane.xlu0 %376 }
 0x272   : > { %v378_v25 = vrot.slane %v377_v24, 4 }
 0x274   : > { %v379_v26 = vadd.f32 %v378_v25, %v377_v24 }
 0x276   : > { %v380_v28 = vrot.slane %v379_v26, 2 }
 0x278   : > { %v381_v29 = vadd.f32 %v380_v28, %v379_v26 }
 0x27a   : > { %v382_v31 = vrot.slane %v381_v29, 1 }
 0x27c   : > { %v383_v32 = vadd.f32 %v382_v31, %v381_v29 }
 0x27e   : > { %498 = vpush %v383_v32 }
 0x27f   : > { %500 = vpush %v403_v33 }
 0x2af   : > { %s499_s5 = spop %498 }
 0x2b0   : > { %s385_s6 = sadd.f32 %s499_s5, %s369_s27  ;;  %s501_s7 = spop %500 }
 0x2b1   : > { %s405_s8 = sadd.f32 %s501_s7, %s491_s28 }
 0x2b2   : > { %387 = sst [smem:[#allocation2]] %s385_s6 }
 0x2b3   : > { %407 = sst [smem:[#allocation2 + $0x1]] %s405_s8 }
 0x2b4   : > { %506 = dma.smem_to_hbm (%p510_p5), %s559_s9, 16, %s415_s4, [#allocation3]  }
 0x2b5   : > { %550 = dma.done.wait (%p510_p5), [#allocation3], 16  }
 0x2b6   : > { %552 = vsyncadd (%p510_p5), [#allocation3], 4294967280 }
 0x2b7   : > { %423 = sfence }
 0x2b8 PF: > { %s14_s12 = sadd.s32 1, %s555_s12  }
 0x2b9   : > { %p11_p6 = scmp.ge.s32.totalorder %s14_s12, 6  }
 0x2bb   :  { %13 = sbr.rel (!%p11_p6) target bundleno = 1 (0x1), region = 73 }
 0x2c0   :  { %429 = vsyncpa [#allocation3], 1 }
 0x2c1   :  { %431 = vsyncpa [#allocation3 + $0x1], 1 }

</bundles_post_ra>
